<compile_context>
chip_gen: v7x
topology: tpu7x:2x2x1
jax: 0.10.0
libtpu: 0.0.40
codegen_flags: <defaults>
</compile_context>

<pallas_src>
import functools

import jax
import jax.numpy as jnp
from jax import lax
from jax.experimental import pallas as pl
from jax.experimental.pallas import tpu as pltpu


def _round_up(x, m):
    return ((x + m - 1) // m) * m


def _mse_kernel(pred_ref, targ_ref, mask_ref, num_ref, den_ref,
                acc_num, acc_den, *, br, bc, steps, rows, ragged):
    i = pl.program_id(0)
    j = pl.program_id(1)

    # Zero the vector accumulators at the start of each split's stream.
    @pl.when(j == 0)
    def _():
        acc_num[...] = jnp.zeros_like(acc_num)
        acc_den[...] = jnp.zeros_like(acc_den)

    pred = pred_ref[...].astype(jnp.float32)
    targ = targ_ref[...].astype(jnp.float32)
    mask = mask_ref[...].astype(jnp.float32)

    res = pred - targ
    sq = mask * res * res

    if ragged:
        # Rows at/after `rows` belong to a partial trailing block or a clamped
        # (re-read) block: their VMEM content is unspecified, so zero their
        # contribution.  Compare + selects are hidden under the DMA bound.
        rem = rows - (i * steps + j) * br
        valid = lax.broadcasted_iota(jnp.int32, (br, bc), 0) < rem
        sq = jnp.where(valid, sq, 0.0)
        mask = jnp.where(valid, mask, 0.0)

    # Fold the (br, bc) tile into the (8, bc) accumulators: this splits only
    # the leading (row) dim, so it is layout-preserving and lowers to pure
    # vreg adds (no cross-lane movement, no per-step XLU reduce).
    acc_num[...] += sq.reshape(br // 8, 8, bc).sum(axis=0)
    acc_den[...] += mask.reshape(br // 8, 8, bc).sum(axis=0)

    # Single cross-lane/cross-sublane reduction in the epilogue.
    @pl.when(j == pl.num_programs(1) - 1)
    def _():
        num_ref[...] = jnp.sum(acc_num[...]).reshape(1, 1, 1)
        den_ref[...] = jnp.sum(acc_den[...]).reshape(1, 1, 1)


def mse_loss_pallas(prediction, target, mask):
    """Masked MSE loss, batch-based reduction (matches MSELoss('batch-based'))."""
    assert prediction.shape == target.shape == mask.shape
    n = int(prediction.size)

    # Lane-dense column width: the largest of {1024, 512, 256, 128} dividing n,
    # so the flat reshape needs no copy; otherwise fall back to 128 + zero-pad.
    bc = 128
    for c in (1024, 512, 256, 128):
        if n % c == 0:
            bc = c
            break
    n_pad = _round_up(n, bc)
    rows = n_pad // bc
    if rows < 8:                      # tiny inputs: ensure one full 8-sublane group
        rows = 8
        n_pad = rows * bc
    pad = n_pad - n

    TILE_ELEMS = 512 * 1024           # 2 MiB f32 per input per pipeline buffer
    tile_rows = max(8, (TILE_ELEMS // bc) // 8 * 8)
    br = min(tile_rows, (rows // 8) * 8)          # multiple of 8, <= rows
    n_blocks = -(-rows // br)
    n_split = 2 if n_blocks >= 2 else 1           # megacore / dual-TC split
    steps = -(-n_blocks // n_split)
    ragged = (n_split * steps * br) != rows       # partial tail or over-coverage

    def _prep(x):
        flat = x.reshape(-1)
        if pad:
            # Zero padding: mask=0 and res=0 there, so both sums are unchanged.
            flat = jnp.pad(flat, (0, pad))
        return flat.reshape(rows, bc)

    pred2d, targ2d, mask2d = _prep(prediction), _prep(target), _prep(mask)

    if n_split * steps > n_blocks:
        # Over-coverage: clamp to the last real block; the kernel masks it out.
        def row_map(i, j):
            return (jnp.minimum(i * steps + j, n_blocks - 1), 0)
    else:
        def row_map(i, j):
            return (i * steps + j, 0)

    in_spec = pl.BlockSpec((br, bc), row_map)
    out_spec = pl.BlockSpec((1, 1, 1), lambda i, j: (i, 0, 0))

    kernel = functools.partial(_mse_kernel, br=br, bc=bc, steps=steps,
                               rows=rows, ragged=ragged)

    num, den = pl.pallas_call(
        kernel,
        out_shape=(
            jax.ShapeDtypeStruct((n_split, 1, 1), jnp.float32),  # sum(mask*res^2)
            jax.ShapeDtypeStruct((n_split, 1, 1), jnp.float32),  # sum(mask)
        ),
        grid_spec=pltpu.PrefetchScalarGridSpec(
            num_scalar_prefetch=0,
            grid=(n_split, steps),
            in_specs=[in_spec, in_spec, in_spec],
            out_specs=(out_spec, out_spec),
            scratch_shapes=[
                pltpu.VMEM((8, bc), jnp.float32),   # partial num accumulator
                pltpu.VMEM((8, bc), jnp.float32),   # partial den accumulator
            ],
        ),
        compiler_params=pltpu.CompilerParams(
            dimension_semantics=("parallel", "arbitrary"),
            vmem_limit_bytes=32 * 1024 * 1024,
        ),
    )(pred2d, targ2d, mask2d)

    # Sum partials from all splits BEFORE the zero check.
    num_total = jnp.sum(num)
    den_total = jnp.sum(den)
    divisor = 2.0 * den_total
    # reduction_batch_based: return 0 when the mask is entirely empty.
    return jnp.where(divisor == 0, jnp.float32(0.0), num_total / divisor)


def _mse_loss_ref(prediction, target, mask):
    """Pure-JAX reference mirroring the PyTorch code."""
    M = jnp.sum(mask, axis=(1, 2))
    res = prediction - target
    image_loss = jnp.sum(mask * res * res, axis=(1, 2))
    divisor = jnp.sum(2.0 * M)
    return jnp.where(divisor == 0, 0.0, jnp.sum(image_loss) / divisor)


if __name__ == "__main__":
    key = jax.random.PRNGKey(0)

    def check(B, H, W, zero_mask=False):
        k1, k2, k3 = jax.random.split(jax.random.fold_in(key, B * H * W), 3)
        pred = jax.random.normal(k1, (B, H, W), dtype=jnp.float32)
        targ = jax.random.normal(k2, (B, H, W), dtype=jnp.float32)
        if zero_mask:
            msk = jnp.zeros((B, H, W), jnp.float32)
        else:
            msk = (jax.random.uniform(k3, (B, H, W)) > 0.25).astype(jnp.float32)
        loss = mse_loss_pallas(pred, targ, msk)
        jax.block_until_ready(loss)
        ref = _mse_loss_ref(pred, targ, msk)
        assert jnp.allclose(loss, ref, rtol=1e-4, atol=1e-6), (B, H, W, loss, ref)

    # Small canonical case (single tile, single grid step, tiny-input pad path).
    check(2, 16, 16)
    # Empty mask -> loss must be exactly 0 (divisor==0 branch).
    check(2, 16, 16, zero_mask=True)
    # Unaligned element count (not a multiple of 128): fallback pad path.
    check(3, 17, 19)
    # Odd row count: ragged in-kernel masking without any HBM padding.
    check(2, 37, 160)
    # Larger case: multi-block stream, 2-way parallel split, partial trailing
    # block + clamped over-coverage block — all handled with zero host-side pad.
    check(5, 480, 512)

    print("KERNEL_OK")
</pallas_src>

<mosaic_0001>
module attributes {stable_mosaic.version = 11 : i64} {
  func.func @_mse_kernel(%arg0: i32, %arg1: i32, %arg2: memref<8x512xf32, #tpu.memory_space<vmem>>, %arg3: memref<8x512xf32, #tpu.memory_space<vmem>>, %arg4: memref<8x512xf32, #tpu.memory_space<vmem>>, %arg5: memref<1x1x1xf32, #tpu.memory_space<vmem>>, %arg6: memref<1x1x1xf32, #tpu.memory_space<vmem>>, %arg7: memref<8x512xf32, #tpu.memory_space<vmem>>, %arg8: memref<8x512xf32, #tpu.memory_space<vmem>>) attributes {dimension_semantics = [#tpu.dimension_semantics<parallel>, #tpu.dimension_semantics<arbitrary>], iteration_bounds = array<i64: 1, 1>, scalar_prefetch = 0 : i64, scratch_operands = 2 : i64, tpu.core_type = #tpu.core_type<tc>, window_params = [{transform_indices = @transform_0, window_bounds = array<i64: 8, 512>}, {transform_indices = @transform_1, window_bounds = array<i64: 8, 512>}, {transform_indices = @transform_2, window_bounds = array<i64: 8, 512>}, {transform_indices = @transform_3, window_bounds = array<i64: 1, 1, 1>}, {transform_indices = @transform_4, window_bounds = array<i64: 1, 1, 1>}]} {
    %c0_i32 = arith.constant 0 : i32
    %0 = arith.cmpi eq, %arg1, %c0_i32 : i32
    %1 = arith.extui %0 : i1 to i32
    %c0_i32_0 = arith.constant 0 : i32
    %2 = arith.cmpi ne, %1, %c0_i32_0 : i32
    scf.if %2 {
      %cst_17 = arith.constant 0.000000e+00 : f32
      %22 = vector.broadcast %cst_17 : f32 to vector<8x512xf32>
      %c0_18 = arith.constant 0 : index
      %c0_19 = arith.constant 0 : index
      %23 = vector.load %arg7[%c0_18, %c0_19] : memref<8x512xf32, #tpu.memory_space<vmem>>, vector<8x512xf32>
      tpu.vector_store %arg7[%c0_18, %c0_19], %22 {strides = array<i32>} : memref<8x512xf32, #tpu.memory_space<vmem>>, vector<8x512xf32>,
      %cst_20 = arith.constant 0.000000e+00 : f32
      %24 = vector.broadcast %cst_20 : f32 to vector<8x512xf32>
      %c0_21 = arith.constant 0 : index
      %c0_22 = arith.constant 0 : index
      %25 = vector.load %arg8[%c0_21, %c0_22] : memref<8x512xf32, #tpu.memory_space<vmem>>, vector<8x512xf32>
      tpu.vector_store %arg8[%c0_21, %c0_22], %24 {strides = array<i32>} : memref<8x512xf32, #tpu.memory_space<vmem>>, vector<8x512xf32>,
    } else {
    }
    %c0 = arith.constant 0 : index
    %c0_1 = arith.constant 0 : index
    %3 = vector.load %arg2[%c0, %c0_1] : memref<8x512xf32, #tpu.memory_space<vmem>>, vector<8x512xf32>
    %c0_2 = arith.constant 0 : index
    %c0_3 = arith.constant 0 : index
    %4 = vector.load %arg3[%c0_2, %c0_3] : memref<8x512xf32, #tpu.memory_space<vmem>>, vector<8x512xf32>
    %c0_4 = arith.constant 0 : index
    %c0_5 = arith.constant 0 : index
    %5 = vector.load %arg4[%c0_4, %c0_5] : memref<8x512xf32, #tpu.memory_space<vmem>>, vector<8x512xf32>
    %6 = arith.subf %3, %4 : vector<8x512xf32>
    %7 = arith.mulf %5, %6 : vector<8x512xf32>
    %8 = arith.mulf %7, %6 : vector<8x512xf32>
    %c0_6 = arith.constant 0 : index
    %c0_7 = arith.constant 0 : index
    %9 = vector.load %arg7[%c0_6, %c0_7] : memref<8x512xf32, #tpu.memory_space<vmem>>, vector<8x512xf32>
    %10 = vector.shape_cast %8 : vector<8x512xf32> to vector<1x8x512xf32>
    %cst = arith.constant dense<0.000000e+00> : vector<8x512xf32>
    %11 = vector.multi_reduction <add>, %10, %cst [0] : vector<1x8x512xf32> to vector<8x512xf32>
    %12 = arith.addf %9, %11 : vector<8x512xf32>
    %c0_8 = arith.constant 0 : index
    %c0_9 = arith.constant 0 : index
    %13 = vector.load %arg7[%c0_8, %c0_9] : memref<8x512xf32, #tpu.memory_space<vmem>>, vector<8x512xf32>
    tpu.vector_store %arg7[%c0_8, %c0_9], %12 {strides = array<i32>} : memref<8x512xf32, #tpu.memory_space<vmem>>, vector<8x512xf32>,
    %c0_10 = arith.constant 0 : index
    %c0_11 = arith.constant 0 : index
    %14 = vector.load %arg8[%c0_10, %c0_11] : memref<8x512xf32, #tpu.memory_space<vmem>>, vector<8x512xf32>
    %15 = vector.shape_cast %5 : vector<8x512xf32> to vector<1x8x512xf32>
    %cst_12 = arith.constant dense<0.000000e+00> : vector<8x512xf32>
    %16 = vector.multi_reduction <add>, %15, %cst_12 [0] : vector<1x8x512xf32> to vector<8x512xf32>
    %17 = arith.addf %14, %16 : vector<8x512xf32>
    %c0_13 = arith.constant 0 : index
    %c0_14 = arith.constant 0 : index
    %18 = vector.load %arg8[%c0_13, %c0_14] : memref<8x512xf32, #tpu.memory_space<vmem>>, vector<8x512xf32>
    tpu.vector_store %arg8[%c0_13, %c0_14], %17 {strides = array<i32>} : memref<8x512xf32, #tpu.memory_space<vmem>>, vector<8x512xf32>,
    %c0_i32_15 = arith.constant 0 : i32
    %19 = arith.cmpi eq, %arg1, %c0_i32_15 : i32
    %20 = arith.extui %19 : i1 to i32
    %c0_i32_16 = arith.constant 0 : i32
    %21 = arith.cmpi ne, %20, %c0_i32_16 : i32
    scf.if %21 {
      %c0_17 = arith.constant 0 : index
      %c0_18 = arith.constant 0 : index
      %22 = vector.load %arg7[%c0_17, %c0_18] : memref<8x512xf32, #tpu.memory_space<vmem>>, vector<8x512xf32>
      %23 = vector.shape_cast %22 : vector<8x512xf32> to vector<1x8x512xf32>
      %cst_19 = arith.constant dense<0.000000e+00> : vector<1xf32>
      %24 = vector.multi_reduction <add>, %23, %cst_19 [1, 2] : vector<1x8x512xf32> to vector<1xf32>
      %25 = vector.shape_cast %24 : vector<1xf32> to vector<1x1x1xf32>
      %26 = vector.extract %25[0, 0, 0] : f32 from vector<1x1x1xf32>
      %27 = vector.broadcast %26 : f32 to vector<1x1x1xf32>
      %c0_20 = arith.constant 0 : index
      %c0_21 = arith.constant 0 : index
      %c0_22 = arith.constant 0 : index
      %28 = vector.load %arg5[%c0_20, %c0_21, %c0_22] : memref<1x1x1xf32, #tpu.memory_space<vmem>>, vector<1x1x1xf32>
      tpu.vector_store %arg5[%c0_20, %c0_21, %c0_22], %27 {strides = array<i32>} : memref<1x1x1xf32, #tpu.memory_space<vmem>>, vector<1x1x1xf32>,
      %c0_23 = arith.constant 0 : index
      %c0_24 = arith.constant 0 : index
      %29 = vector.load %arg8[%c0_23, %c0_24] : memref<8x512xf32, #tpu.memory_space<vmem>>, vector<8x512xf32>
      %30 = vector.shape_cast %29 : vector<8x512xf32> to vector<1x8x512xf32>
      %cst_25 = arith.constant dense<0.000000e+00> : vector<1xf32>
      %31 = vector.multi_reduction <add>, %30, %cst_25 [1, 2] : vector<1x8x512xf32> to vector<1xf32>
      %32 = vector.shape_cast %31 : vector<1xf32> to vector<1x1x1xf32>
      %33 = vector.extract %32[0, 0, 0] : f32 from vector<1x1x1xf32>
      %34 = vector.broadcast %33 : f32 to vector<1x1x1xf32>
      %c0_26 = arith.constant 0 : index
      %c0_27 = arith.constant 0 : index
      %c0_28 = arith.constant 0 : index
      %35 = vector.load %arg6[%c0_26, %c0_27, %c0_28] : memref<1x1x1xf32, #tpu.memory_space<vmem>>, vector<1x1x1xf32>
      tpu.vector_store %arg6[%c0_26, %c0_27, %c0_28], %34 {strides = array<i32>} : memref<1x1x1xf32, #tpu.memory_space<vmem>>, vector<1x1x1xf32>,
    } else {
    }
    return
  }
  func.func @transform_0(%arg0: i32, %arg1: i32) -> (i32, i32) {
    %c1_i32 = arith.constant 1 : i32
    %0 = arith.muli %arg0, %c1_i32 : i32
    %1 = arith.addi %0, %arg1 : i32
    %c0_i32 = arith.constant 0 : i32
    %c0_i32_0 = arith.constant 0 : i32
    return %1, %c0_i32 : i32, i32
  }
  func.func @transform_1(%arg0: i32, %arg1: i32) -> (i32, i32) {
    %c1_i32 = arith.constant 1 : i32
    %0 = arith.muli %arg0, %c1_i32 : i32
    %1 = arith.addi %0, %arg1 : i32
    %c0_i32 = arith.constant 0 : i32
    %c0_i32_0 = arith.constant 0 : i32
    return %1, %c0_i32 : i32, i32
  }
  func.func @transform_2(%arg0: i32, %arg1: i32) -> (i32, i32) {
    %c1_i32 = arith.constant 1 : i32
    %0 = arith.muli %arg0, %c1_i32 : i32
    %1 = arith.addi %0, %arg1 : i32
    %c0_i32 = arith.constant 0 : i32
    %c0_i32_0 = arith.constant 0 : i32
    return %1, %c0_i32 : i32, i32
  }
  func.func @transform_3(%arg0: i32, %arg1: i32) -> (i32, i32, i32) {
    %c0_i32 = arith.constant 0 : i32
    %c0_i32_0 = arith.constant 0 : i32
    %c0_i32_1 = arith.constant 0 : i32
    return %arg0, %c0_i32, %c0_i32_0 : i32, i32, i32
  }
  func.func @transform_4(%arg0: i32, %arg1: i32) -> (i32, i32, i32) {
    %c0_i32 = arith.constant 0 : i32
    %c0_i32_0 = arith.constant 0 : i32
    %c0_i32_1 = arith.constant 0 : i32
    return %arg0, %c0_i32, %c0_i32_0 : i32, i32, i32
  }
}

</mosaic_0001>

<bundles_post_ra>
// kernel: tpu_custom_call.1
= control target key start
LH: loop header
LB: loop body
LE: loop exit
PB: predicated region body
PF: predicated region fallthrough
CT: control target
= control target key end

     0   :  { %10 = vsyncpa [#allocation5], 0  ;;  %s425_s0 = inlined_call_operand.hbm [shape: f32[8,512], index: 0, kind: input, shape index: {}]   ;;  %s426_s1 = inlined_call_operand.hbm [shape: f32[8,512], index: 1, kind: input, shape index: {}]   ;;  %s427_s2 = inlined_call_operand.hbm [shape: f32[8,512], index: 2, kind: input, shape index: {}]   ;;  %s428_s3 = inlined_call_operand.hbm [shape: f32[1,1,1], index: 3, kind: output, shape index: {0}]   ;;  %s429_s4 = inlined_call_operand.hbm [shape: f32[1,1,1], index: 4, kind: output, shape index: {1}]  }
   0x1   :  { %11 = vsyncpa [#allocation8], 0 }
   0x2   :  { %12 = vsyncpa [#allocation6], 0 }
   0x3   :  { %13 = vsyncpa [#allocation12], 0  ;;  %s333_s15 = smov [#allocation7]   ;;  %s334_s17 = smov [#allocation4]  }
   0x4   :  { %s38_s16 = sshll.u32 %s333_s15, 4  ;;  %s24_s18 = sshll.u32 %s334_s17, 4  ;;  %s39_s16 = int_to_ptr.vmem [resolvable:$true] %s38_s16  ;;  %s25_s18 = int_to_ptr.vmem [resolvable:$true] %s24_s18 }
   0x5   :  { %s215_s21 = scalar_lea.hbm %s426_s1, 512 }
   0x6   :  { %p216_p0 = scmp.ne.s32.totalorder %s426_s1, %s215_s21  ;;  %p219_p1 = scmp.lt.u32.totalorder %s215_s21, %s426_s1 }
   0x8   :  { %p221_p2 = pnand %p219_p1, %p216_p0 }
   0xa   :  { %224 = shalt.err (!%p221_p2)
}
   0xb   :  { %s225_s26 = scalar_lea.vmem %s39_s16, 512  ;;  %p230_p4 = scmp.lt.s32.totalorder %s39_s16, %s39_s16 }
   0xc   :  { %p226_p3 = scmp.ne.s32.totalorder %s39_s16, %s225_s26  ;;  %p231_p5 = scmp.lt.s32.totalorder %s225_s26, %s225_s26 }
   0xe   :  { %p232_p6 = por %p231_p5, %p230_p4 }
  0x10   :  { %p233_p7 = pnand %p232_p6, %p226_p3 }
  0x12   :  { %236 = shalt.err (!%p233_p7)
}
  0x13   :  { %41 = dma.hbm_to_vmem [thread:$0]  %s426_s1, 512, %s39_s16, [#allocation8]  }
  0x14   :  { %s237_s5 = scalar_lea.hbm %s425_s0, 512 }
  0x15   :  { %p238_p8 = scmp.ne.s32.totalorder %s425_s0, %s237_s5  ;;  %p241_p9 = scmp.lt.u32.totalorder %s237_s5, %s425_s0 }
  0x17   :  { %p243_p10 = pnand %p241_p9, %p238_p8 }
  0x19   :  { %246 = shalt.err (!%p243_p10)
}
  0x1a   :  { %s247_s10 = scalar_lea.vmem %s25_s18, 512  ;;  %p252_p12 = scmp.lt.s32.totalorder %s25_s18, %s25_s18 }
  0x1b   :  { %p248_p11 = scmp.ne.s32.totalorder %s25_s18, %s247_s10  ;;  %p253_p13 = scmp.lt.s32.totalorder %s247_s10, %s247_s10 }
  0x1d   :  { %p254_p0 = por %p253_p13, %p252_p12 }
  0x1f   :  { %p255_p1 = pnand %p254_p0, %p248_p11 }
  0x21   :  { %258 = shalt.err (!%p255_p1)
}
  0x22   :  { %27 = dma.hbm_to_vmem [thread:$0]  %s425_s0, 512, %s25_s18, [#allocation5]  }
  0x23   :  { %s335_s12 = smov [#allocation9]   ;;  %s259_s16 = scalar_lea.hbm %s427_s2, 512 }
  0x24   :  { %s52_s13 = sshll.u32 %s335_s12, 4  ;;  %p260_p2 = scmp.ne.s32.totalorder %s427_s2, %s259_s16  ;;  %s53_s13 = int_to_ptr.vmem [resolvable:$true] %s52_s13 }
  0x25   :  { %p263_p3 = scmp.lt.u32.totalorder %s259_s16, %s427_s2 }
  0x27   :  { %p265_p4 = pnand %p263_p3, %p260_p2 }
  0x29   :  { %268 = shalt.err (!%p265_p4)
}
  0x2a   :  { %s269_s22 = scalar_lea.vmem %s53_s13, 512  ;;  %p274_p6 = scmp.lt.s32.totalorder %s53_s13, %s53_s13 }
  0x2b   :  { %p270_p5 = scmp.ne.s32.totalorder %s53_s13, %s269_s22  ;;  %p275_p7 = scmp.lt.s32.totalorder %s269_s22, %s269_s22 }
  0x2d   :  { %p276_p8 = por %p275_p7, %p274_p6 }
  0x2f   :  { %p277_p9 = pnand %p276_p8, %p270_p5 }
  0x31   :  { %280 = shalt.err (!%p277_p9)
}
  0x32   :  { %55 = dma.hbm_to_vmem [thread:$0]  %s427_s2, 512, %s53_s13, [#allocation8]  }
  0x33   :  { %325 = dma.done.wait [#allocation5], 512  }
  0x34   :  { %326 = vsyncadd [#allocation5], 4294966784 }
  0x35   :  { %327 = dma.done.wait [#allocation8], 1024  }
  0x36   :  { %328 = vsyncadd [#allocation8], 4294966272  ;;  %v80_v0 = vld [vmem:[#allocation4] sm:$0xff]  ;;  %v81_v1 = vld [vmem:[#allocation4 + $0x8] sm:$0xff]  ;;  %s336_s2 = smov [#allocation10]   ;;  %vm156_vm0 = vcmask 0  }
  0x37   :  { %v82_v2 = vld [vmem:[#allocation4 + $0x10] sm:$0xff]  ;;  %v83_v3 = vld [vmem:[#allocation4 + $0x18] sm:$0xff]  ;;  %v84_v4 = vld [vmem:[#allocation7] sm:$0xff]  ;;  %s182_s23 = sshll.u32 %s336_s2, 4  ;;  %s337_s25 = smov [#allocation11]   ;;  %s183_s23 = int_to_ptr.vmem [resolvable:$true] %s182_s23 }
  0x38   :  { %v85_v5 = vld [vmem:[#allocation7 + $0x8] sm:$0xff]  ;;  %v86_v6 = vld [vmem:[#allocation7 + $0x10] sm:$0xff]  ;;  %v87_v7 = vld [vmem:[#allocation7 + $0x18] sm:$0xff]  ;;  %v92_v9 = vsub.f32 %v80_v0, %v84_v4  ;;  %s192_s26 = sshll.u32 %s337_s25, 4  ;;  %s281_s27 = scalar_lea.vmem %s183_s23, 16  ;;  %s193_s26 = int_to_ptr.vmem [resolvable:$true] %s192_s26 }
  0x39   :  { %v88_v8 = vld [vmem:[#allocation9] sm:$0xff]  ;;  %v93_v10 = vsub.f32 %v81_v1, %v85_v5  ;;  %v89_v11 = vld [vmem:[#allocation9 + $0x8] sm:$0xff]  ;;  %v90_v12 = vld [vmem:[#allocation9 + $0x10] sm:$0xff]  ;;  %v94_v14 = vsub.f32 %v82_v2, %v86_v6  ;;  %v95_v15 = vsub.f32 %v83_v3, %v87_v7  ;;  %p282_p10 = scmp.ne.s32.totalorder %s183_s23, %s281_s27  ;;  %s285_s28 = scalar_lea.vmem %s183_s23, 32 }
  0x3a   :  { %v91_v13 = vld [vmem:[#allocation9 + $0x18] sm:$0xff]  ;;  %v96_v16 = vmul.f32 %v92_v9, %v88_v8  ;;  %v162_v22 = vadd.f32 %v89_v11, %v88_v8  ;;  %p286_p11 = scmp.lt.s32.totalorder %s183_s23, %s183_s23  ;;  %p287_p12 = scmp.lt.s32.totalorder %s285_s28, %s281_s27 }
  0x3b   :  { %v97_v17 = vmul.f32 %v93_v10, %v89_v11  ;;  %v98_v18 = vmul.f32 %v94_v14, %v90_v12  ;;  %v99_v19 = vmul.f32 %v95_v15, %v91_v13 }
  0x3c   :  { %v100_v20 = vmul.f32 %v96_v16, %v92_v9  ;;  %v163_v27 = vadd.f32 %v162_v22, %v90_v12  ;;  %p288_p13 = por %p287_p12, %p286_p11 }
  0x3d   :  { %v101_v21 = vmul.f32 %v97_v17, %v93_v10  ;;  %v102_v23 = vmul.f32 %v98_v18, %v94_v14  ;;  %v103_v24 = vmul.f32 %v99_v19, %v95_v15 }
  0x3e   :  { %v164_v29 = vadd.f32 %v163_v27, %v91_v13  ;;  %p289_p0 = pnand %p288_p13, %p282_p10 }
  0x3f   :  { %v143_v25 = vadd.f32 %v101_v21, %v100_v20 }
  0x41   :  { %v144_v26 = vadd.f32 %v143_v25, %v102_v23 }
  0x43   :  { %v145_v28 = vadd.f32 %v144_v26, %v103_v24 }
  0x45   :  { %146 = vadd.xlane.f32.xlu0 %v145_v28 }
  0x49   :  { %165 = vadd.xlane.f32.xlu0 %v164_v29 }
  0xd2   :  { %v147_v30 = vpop.xlane.xlu0 %146 }
  0xd3   :  { %v148_v31 = vrot.slane %v147_v30, 4 }
  0xd5   :  { %v149_v32 = vadd.f32 %v148_v31, %v147_v30 }
  0xd6   :  { %v166_v33 = vpop.xlane.xlu0 %165 }
  0xd7   :  { %v150_v34 = vrot.slane %v149_v32, 2  ;;  %v167_v35 = vrot.slane %v166_v33, 4 }
  0xd9   :  { %v168_v36 = vadd.f32 %v167_v35, %v166_v33  ;;  %v151_v37 = vadd.f32 %v150_v34, %v149_v32 }
  0xdb   :  { %v169_v38 = vrot.slane %v168_v36, 2  ;;  %v152_v39 = vrot.slane %v151_v37, 1 }
  0xdd   :  { %v170_v40 = vadd.f32 %v169_v38, %v168_v36  ;;  %v153_v41 = vadd.f32 %v152_v39, %v151_v37 }
  0xdf   :  { %206 = vpush %v153_v41  ;;  %v171_v42 = vrot.slane %v170_v40, 1 }
  0xe1   :  { %v172_v43 = vadd.f32 %v171_v42, %v170_v40 }
  0xe3   :  { %208 = vpush %v172_v43 }
 0x110   :  { %s207_s24 = spop %206 }
 0x111   :  { %v155_v44 = vstv %s207_s24 }
 0x112   :  { %157 = vst.msk [vmem:[#allocation10] sm:$0x1] %vm156_vm0, %v155_v44 }
 0x113   :  { %292 = shalt.err (!%p289_p0)
}
 0x114   :  { %s293_s5 = scalar_lea.hbm %s428_s3, 16 }
 0x115   :  { %p294_p1 = scmp.ne.s32.totalorder %s428_s3, %s293_s5  ;;  %p297_p2 = scmp.lt.u32.totalorder %s293_s5, %s428_s3 }
 0x117   :  { %p299_p3 = pnand %p297_p2, %p294_p1 }
 0x119   :  { %302 = shalt.err (!%p299_p3)
}
 0x11a   :  { %185 = dma.vmem_to_hbm [thread:$0]  %s183_s23, 16, %s428_s3, [#allocation6]  }
 0x11b   :  { %s209_s11 = spop %208  ;;  %s303_s12 = scalar_lea.vmem %s193_s26, 16 }
 0x11c   :  { %v174_v45 = vstv %s209_s11  ;;  %p304_p4 = scmp.ne.s32.totalorder %s193_s26, %s303_s12  ;;  %s307_s13 = scalar_lea.vmem %s193_s26, 32 }
 0x11d   :  { %175 = vst.msk [vmem:[#allocation11] sm:$0x1] %vm156_vm0, %v174_v45  ;;  %p308_p5 = scmp.lt.s32.totalorder %s193_s26, %s193_s26  ;;  %p309_p6 = scmp.lt.s32.totalorder %s307_s13, %s303_s12 }
 0x11f   :  { %p310_p7 = por %p309_p6, %p308_p5 }
 0x121   :  { %p311_p8 = pnand %p310_p7, %p304_p4 }
 0x123   :  { %314 = shalt.err (!%p311_p8)
}
 0x124   :  { %s315_s16 = scalar_lea.hbm %s429_s4, 16 }
 0x125   :  { %p316_p9 = scmp.ne.s32.totalorder %s429_s4, %s315_s16  ;;  %p319_p10 = scmp.lt.u32.totalorder %s315_s16, %s429_s4 }
 0x127   :  { %p321_p11 = pnand %p319_p10, %p316_p9 }
 0x129   :  { %324 = shalt.err (!%p321_p11)
}
 0x12a   :  { %195 = dma.vmem_to_hbm [thread:$0]  %s193_s26, 16, %s429_s4, [#allocation12]  }
 0x12b   :  { %329 = dma.done.wait [#allocation6], 16  }
 0x12c   :  { %330 = vsyncadd [#allocation6], 4294967280 }
 0x12d   :  { %331 = dma.done.wait [#allocation12], 16  }
 0x12e   :  { %332 = vsyncadd [#allocation12], 4294967280 }
 0x12f   :  { %202 = vsyncpa [#allocation5], 1 }
 0x130   :  { %203 = vsyncpa [#allocation8], 1 }
 0x131   :  { %204 = vsyncpa [#allocation6], 1 }
 0x132   :  { %205 = vsyncpa [#allocation12], 1 }

</bundles_post_ra>
